<compile_context>
chip_gen: v7x
topology: tpu7x:2x2x1
jax: 0.10.0
libtpu: 0.0.40
codegen_flags: <defaults>
</compile_context>

<pallas_src>
import functools

import jax
import jax.numpy as jnp
from jax.experimental import pallas as pl
from jax.experimental.pallas import tpu as pltpu

_LANES = 128
_MAX_TILE_ROWS = 512      # 512 x 128 x 4B = 256 KiB per input tile (f32); well under
                          # scoped-VMEM limits on v5e/v6e/v7x with double buffering.
_NUM_PARTIALS = 2         # leading "parallel" grid axis (uses both TCs on v7x)


def _round_up(x, m):
    return (x + m - 1) // m * m


def _pair_sum_kernel(a_ref, b_ref, out_ref, acc_ref, *, op):
    """Accumulate sum(op(a, b)) over the inner (reduction) grid axis."""
    i = pl.program_id(1)

    @pl.when(i == 0)
    def _init():
        acc_ref[...] = jnp.zeros_like(acc_ref)

    a = a_ref[...].astype(jnp.float32)
    b = b_ref[...].astype(jnp.float32)
    acc_ref[...] += op(a, b)          # steady-state: pure VPU elementwise work

    @pl.when(i == pl.num_programs(1) - 1)
    def _finalize():
        acc = acc_ref[...]
        groups = acc.shape[0] // 8
        # (tile_rows,128) -> (groups,8,128): layout-preserving sublane split; the
        # axis-0 sum is plain vreg-wise VPU adds.  Done once per parallel slice.
        out_ref[...] = acc.reshape(groups, 8, _LANES).sum(axis=0)


def _tiled_pair_sum(a, b, op):
    """sum(op(a, b)) over all elements via a tiled, pipelined Pallas reduction."""
    assert a.shape == b.shape, (a.shape, b.shape)
    n = a.size
    a_flat = a.reshape(-1)
    b_flat = b.reshape(-1)

    n_rows = _round_up(pl.cdiv(n, _LANES), 8)
    tile_rows = min(_MAX_TILE_ROWS, n_rows)
    n_tiles = pl.cdiv(n_rows, tile_rows)
    num_parallel = _NUM_PARTIALS if n_tiles >= _NUM_PARTIALS else 1
    n_tiles = _round_up(n_tiles, num_parallel)
    tiles_per_part = n_tiles // num_parallel

    padded = n_tiles * tile_rows * _LANES
    pad = padded - n
    # Zero padding is neutral: (0-0)^2 == 0 and minimum(0, 0) == 0.
    a2 = jnp.pad(a_flat, (0, pad)).reshape(n_tiles * tile_rows, _LANES)
    b2 = jnp.pad(b_flat, (0, pad)).reshape(n_tiles * tile_rows, _LANES)

    def in_map(c, i):
        return (c * tiles_per_part + i, 0)

    itemsize = jnp.dtype(a.dtype).itemsize
    partials = pl.pallas_call(
        functools.partial(_pair_sum_kernel, op=op),
        out_shape=jax.ShapeDtypeStruct((num_parallel * 8, _LANES), jnp.float32),
        grid_spec=pltpu.PrefetchScalarGridSpec(
            num_scalar_prefetch=0,
            grid=(num_parallel, tiles_per_part),
            in_specs=[
                pl.BlockSpec((tile_rows, _LANES), in_map),
                pl.BlockSpec((tile_rows, _LANES), in_map),
            ],
            out_specs=pl.BlockSpec((8, _LANES), lambda c, i: (c, 0)),
            scratch_shapes=[pltpu.VMEM((tile_rows, _LANES), jnp.float32)],
        ),
        compiler_params=pltpu.CompilerParams(
            dimension_semantics=("parallel", "arbitrary"),
            vmem_limit_bytes=32 * 1024 * 1024,
        ),
        cost_estimate=pl.CostEstimate(
            flops=3 * padded,
            transcendentals=0,
            bytes_accessed=2 * padded * itemsize + num_parallel * 8 * _LANES * 4,
        ),
    )(a2, b2)
    # Tiny (num_parallel*8, 128) partial block: final reduce + scaling in JAX.
    return jnp.sum(partials)


def coverage_loss(outputs, targets, attn_std=None, attn_cov=None, lmbd=0.0):
    """CustomLoss.forward with regularLoss = MSELoss(reduction='mean')."""
    mse_sum = _tiled_pair_sum(outputs, targets, lambda a, b: (a - b) * (a - b))
    loss = mse_sum / float(outputs.size)
    if attn_std is not None:
        bs = attn_std.shape[1]                      # attns['std'] is (src_sz, bs, tgt_sz)
        cov_sum = _tiled_pair_sum(attn_std, attn_cov, jnp.minimum)
        loss = loss + lmbd * cov_sum / float(bs)
    return loss


def coverage_loss_reference(outputs, targets, attn_std, attn_cov, lmbd):
    bs = attn_std.shape[1]
    mse = jnp.mean((outputs.astype(jnp.float32) - targets.astype(jnp.float32)) ** 2)
    cov = jnp.sum(jnp.minimum(attn_std, attn_cov).astype(jnp.float32))
    return mse + lmbd * cov / bs


if __name__ == "__main__":
    # Small shapes consistent with the module's forward:
    #   attns['std'] / attns['coverage'] : (src_sz, bs, tgt_sz)
    #   outputs / targets                : (bs, tgt_sz, hidden)
    src_sz, bs, tgt_sz, hidden = 16, 2, 8, 32
    lmbd = 0.5

    key = jax.random.PRNGKey(0)
    k0, k1, k2, k3 = jax.random.split(key, 4)
    outputs = jax.random.normal(k0, (bs, tgt_sz, hidden), dtype=jnp.float32)
    targets = jax.random.normal(k1, (bs, tgt_sz, hidden), dtype=jnp.float32)
    attn_std = jax.random.uniform(k2, (src_sz, bs, tgt_sz), dtype=jnp.float32)
    attn_cov = jax.random.uniform(k3, (src_sz, bs, tgt_sz), dtype=jnp.float32)

    loss = coverage_loss(outputs, targets, attn_std, attn_cov, lmbd)
    jax.block_until_ready(loss)

    ref = coverage_loss_reference(outputs, targets, attn_std, attn_cov, lmbd)
    assert jnp.allclose(loss, ref, rtol=1e-5, atol=1e-5), (loss, ref)

    # Also exercise a larger, multi-tile / dual-partial path for coverage.
    ko0, ko1 = jax.random.split(jax.random.PRNGKey(1))
    big_a = jax.random.normal(ko0, (32, 64, 256), dtype=jnp.float32)
    big_b = jax.random.normal(ko1, (32, 64, 256), dtype=jnp.float32)
    big = _tiled_pair_sum(big_a, big_b, lambda a, b: (a - b) * (a - b))
    jax.block_until_ready(big)
    big_ref = jnp.sum((big_a - big_b) ** 2)
    assert jnp.allclose(big, big_ref, rtol=1e-4, atol=1e-3), (big, big_ref)

    print("KERNEL_OK")
</pallas_src>

<mosaic_0001>
module attributes {stable_mosaic.version = 11 : i64} {
  func.func @_pair_sum_kernel(%arg0: i32, %arg1: i32, %arg2: memref<8x128xf32, #tpu.memory_space<vmem>>, %arg3: memref<8x128xf32, #tpu.memory_space<vmem>>, %arg4: memref<8x128xf32, #tpu.memory_space<vmem>>, %arg5: memref<8x128xf32, #tpu.memory_space<vmem>>) attributes {dimension_semantics = [#tpu.dimension_semantics<parallel>, #tpu.dimension_semantics<arbitrary>], iteration_bounds = array<i64: 1, 1>, scalar_prefetch = 0 : i64, scratch_operands = 1 : i64, tpu.core_type = #tpu.core_type<tc>, window_params = [{transform_indices = @transform_0, window_bounds = array<i64: 8, 128>}, {transform_indices = @transform_1, window_bounds = array<i64: 8, 128>}, {transform_indices = @transform_2, window_bounds = array<i64: 8, 128>}]} {
    %c0_i32 = arith.constant 0 : i32
    %0 = arith.cmpi eq, %arg1, %c0_i32 : i32
    %1 = arith.extui %0 : i1 to i32
    %c0_i32_0 = arith.constant 0 : i32
    %2 = arith.cmpi ne, %1, %c0_i32_0 : i32
    scf.if %2 {
      %cst = arith.constant 0.000000e+00 : f32
      %14 = vector.broadcast %cst : f32 to vector<8x128xf32>
      %c0_10 = arith.constant 0 : index
      %c0_11 = arith.constant 0 : index
      %15 = vector.load %arg5[%c0_10, %c0_11] : memref<8x128xf32, #tpu.memory_space<vmem>>, vector<8x128xf32>
      tpu.vector_store %arg5[%c0_10, %c0_11], %14 {strides = array<i32>} : memref<8x128xf32, #tpu.memory_space<vmem>>, vector<8x128xf32>,
    } else {
    }
    %c0 = arith.constant 0 : index
    %c0_1 = arith.constant 0 : index
    %3 = vector.load %arg2[%c0, %c0_1] : memref<8x128xf32, #tpu.memory_space<vmem>>, vector<8x128xf32>
    %c0_2 = arith.constant 0 : index
    %c0_3 = arith.constant 0 : index
    %4 = vector.load %arg3[%c0_2, %c0_3] : memref<8x128xf32, #tpu.memory_space<vmem>>, vector<8x128xf32>
    %c0_4 = arith.constant 0 : index
    %c0_5 = arith.constant 0 : index
    %5 = vector.load %arg5[%c0_4, %c0_5] : memref<8x128xf32, #tpu.memory_space<vmem>>, vector<8x128xf32>
    %6 = arith.subf %3, %4 : vector<8x128xf32>
    %7 = arith.subf %3, %4 : vector<8x128xf32>
    %8 = arith.mulf %6, %7 : vector<8x128xf32>
    %9 = arith.addf %5, %8 : vector<8x128xf32>
    %c0_6 = arith.constant 0 : index
    %c0_7 = arith.constant 0 : index
    %10 = vector.load %arg5[%c0_6, %c0_7] : memref<8x128xf32, #tpu.memory_space<vmem>>, vector<8x128xf32>
    tpu.vector_store %arg5[%c0_6, %c0_7], %9 {strides = array<i32>} : memref<8x128xf32, #tpu.memory_space<vmem>>, vector<8x128xf32>,
    %c0_i32_8 = arith.constant 0 : i32
    %11 = arith.cmpi eq, %arg1, %c0_i32_8 : i32
    %12 = arith.extui %11 : i1 to i32
    %c0_i32_9 = arith.constant 0 : i32
    %13 = arith.cmpi ne, %12, %c0_i32_9 : i32
    scf.if %13 {
      %c0_10 = arith.constant 0 : index
      %c0_11 = arith.constant 0 : index
      %14 = vector.load %arg5[%c0_10, %c0_11] : memref<8x128xf32, #tpu.memory_space<vmem>>, vector<8x128xf32>
      %15 = vector.shape_cast %14 : vector<8x128xf32> to vector<1x8x128xf32>
      %cst = arith.constant dense<0.000000e+00> : vector<8x128xf32>
      %16 = vector.multi_reduction <add>, %15, %cst [0] : vector<1x8x128xf32> to vector<8x128xf32>
      %c0_12 = arith.constant 0 : index
      %c0_13 = arith.constant 0 : index
      %17 = vector.load %arg4[%c0_12, %c0_13] : memref<8x128xf32, #tpu.memory_space<vmem>>, vector<8x128xf32>
      tpu.vector_store %arg4[%c0_12, %c0_13], %16 {strides = array<i32>} : memref<8x128xf32, #tpu.memory_space<vmem>>, vector<8x128xf32>,
    } else {
    }
    return
  }
  func.func @transform_0(%arg0: i32, %arg1: i32) -> (i32, i32) {
    %c1_i32 = arith.constant 1 : i32
    %0 = arith.muli %arg0, %c1_i32 : i32
    %1 = arith.addi %0, %arg1 : i32
    %c0_i32 = arith.constant 0 : i32
    %c0_i32_0 = arith.constant 0 : i32
    return %1, %c0_i32 : i32, i32
  }
  func.func @transform_1(%arg0: i32, %arg1: i32) -> (i32, i32) {
    %c1_i32 = arith.constant 1 : i32
    %0 = arith.muli %arg0, %c1_i32 : i32
    %1 = arith.addi %0, %arg1 : i32
    %c0_i32 = arith.constant 0 : i32
    %c0_i32_0 = arith.constant 0 : i32
    return %1, %c0_i32 : i32, i32
  }
  func.func @transform_2(%arg0: i32, %arg1: i32) -> (i32, i32) {
    %c0_i32 = arith.constant 0 : i32
    %c0_i32_0 = arith.constant 0 : i32
    return %arg0, %c0_i32 : i32, i32
  }
}

</mosaic_0001>

<bundles_post_ra>
// kernel: tpu_custom_call.1
= control target key start
LH: loop header
LB: loop body
LE: loop exit
PB: predicated region body
PF: predicated region fallthrough
CT: control target
= control target key end

     0   :  { %7 = vsyncpa [#allocation4], 0  ;;  %s207_s0 = inlined_call_operand.hbm [shape: f32[8,128], index: 0, kind: input, shape index: {}]   ;;  %s208_s1 = inlined_call_operand.hbm [shape: f32[8,128], index: 1, kind: input, shape index: {}]   ;;  %s209_s2 = inlined_call_operand.hbm [shape: f32[8,128], index: 2, kind: output, shape index: {}]  }
   0x1   :  { %8 = vsyncpa [#allocation7], 0 }
   0x2   :  { %9 = vsyncpa [#allocation5], 0  ;;  %s153_s9 = smov [#allocation3]   ;;  %s154_s11 = smov [#allocation6]  }
   0x3   :  { %s19_s10 = sshll.u32 %s153_s9, 4  ;;  %s32_s12 = sshll.u32 %s154_s11, 4  ;;  %s20_s10 = int_to_ptr.vmem [resolvable:$true] %s19_s10  ;;  %s33_s12 = int_to_ptr.vmem [resolvable:$true] %s32_s12 }
   0x4   :  { %s81_s15 = scalar_lea.hbm %s207_s0, 128 }
   0x5   :  { %p82_p0 = scmp.ne.s32.totalorder %s207_s0, %s81_s15  ;;  %p85_p1 = scmp.lt.u32.totalorder %s81_s15, %s207_s0 }
   0x7   :  { %p87_p2 = pnand %p85_p1, %p82_p0 }
   0x9   :  { %90 = shalt.err (!%p87_p2)
}
   0xa   :  { %s91_s20 = scalar_lea.vmem %s20_s10, 128  ;;  %p96_p4 = scmp.lt.s32.totalorder %s20_s10, %s20_s10 }
   0xb   :  { %p92_p3 = scmp.ne.s32.totalorder %s20_s10, %s91_s20  ;;  %p97_p5 = scmp.lt.s32.totalorder %s91_s20, %s91_s20 }
   0xd   :  { %p98_p6 = por %p97_p5, %p96_p4 }
   0xf   :  { %p99_p7 = pnand %p98_p6, %p92_p3 }
  0x11   :  { %102 = shalt.err (!%p99_p7)
}
  0x12   :  { %22 = dma.hbm_to_vmem [thread:$0]  %s207_s0, 128, %s20_s10, [#allocation4]  }
  0x13   :  { %s103_s25 = scalar_lea.hbm %s208_s1, 128 }
  0x14   :  { %p104_p8 = scmp.ne.s32.totalorder %s208_s1, %s103_s25  ;;  %p107_p9 = scmp.lt.u32.totalorder %s103_s25, %s208_s1 }
  0x16   :  { %p109_p10 = pnand %p107_p9, %p104_p8 }
  0x18   :  { %112 = shalt.err (!%p109_p10)
}
  0x19   :  { %s113_s30 = scalar_lea.vmem %s33_s12, 128  ;;  %p118_p12 = scmp.lt.s32.totalorder %s33_s12, %s33_s12 }
  0x1a   :  { %p114_p11 = scmp.ne.s32.totalorder %s33_s12, %s113_s30  ;;  %p119_p13 = scmp.lt.s32.totalorder %s113_s30, %s113_s30 }
  0x1c   :  { %p120_p0 = por %p119_p13, %p118_p12 }
  0x1e   :  { %p121_p1 = pnand %p120_p0, %p114_p11 }
  0x20   :  { %124 = shalt.err (!%p121_p1)
}
  0x21   :  { %35 = dma.hbm_to_vmem [thread:$0]  %s208_s1, 128, %s33_s12, [#allocation7]  }
  0x22   :  { %147 = dma.done.wait [#allocation4], 128  }
  0x23   :  { %148 = vsyncadd [#allocation4], 4294967168 }
  0x24   :  { %149 = dma.done.wait [#allocation7], 128  }
  0x25   :  { %150 = vsyncadd [#allocation7], 4294967168  ;;  %v49_v0 = vld [vmem:[#allocation3] sm:$0xff]  ;;  %v50_v1 = vld [vmem:[#allocation6] sm:$0xff]  ;;  %s155_s4 = smov [#allocation8]  }
  0x26   :  { %s68_s5 = sshll.u32 %s155_s4, 4  ;;  %v52_v2 = vsub.f32 %v49_v0, %v50_v1  ;;  %s69_s5 = int_to_ptr.vmem [resolvable:$true] %s68_s5 }
  0x27   :  { %s125_s6 = scalar_lea.vmem %s69_s5, 128  ;;  %p130_p3 = scmp.lt.s32.totalorder %s69_s5, %s69_s5 }
  0x28   :  { %v53_v3 = vmul.f32 %v52_v2, %v52_v2  ;;  %p126_p2 = scmp.ne.s32.totalorder %s69_s5, %s125_s6  ;;  %p131_p4 = scmp.lt.s32.totalorder %s125_s6, %s125_s6 }
  0x2a   :  { %61 = vst [vmem:[#allocation8] sm:$0xff] %v53_v3  ;;  %p132_p5 = por %p131_p4, %p130_p3 }
  0x2c   :  { %p133_p6 = pnand %p132_p5, %p126_p2 }
  0x2e   :  { %136 = shalt.err (!%p133_p6)
}
  0x2f   :  { %s137_s8 = scalar_lea.hbm %s209_s2, 128 }
  0x30   :  { %p138_p7 = scmp.ne.s32.totalorder %s209_s2, %s137_s8  ;;  %p141_p8 = scmp.lt.u32.totalorder %s137_s8, %s209_s2 }
  0x32   :  { %p143_p9 = pnand %p141_p8, %p138_p7 }
  0x34   :  { %146 = shalt.err (!%p143_p9)
}
  0x35   :  { %71 = dma.vmem_to_hbm [thread:$0]  %s69_s5, 128, %s209_s2, [#allocation5]  }
  0x36   :  { %151 = dma.done.wait [#allocation5], 128  }
  0x37   :  { %152 = vsyncadd [#allocation5], 4294967168 }
  0x38   :  { %75 = vsyncpa [#allocation4], 1 }
  0x39   :  { %76 = vsyncpa [#allocation7], 1 }
  0x3a   :  { %77 = vsyncpa [#allocation5], 1 }

</bundles_post_ra>
